<compile_context>
chip_gen: v7x
topology: tpu7x:2x2x1
jax: 0.10.0
libtpu: 0.0.40
codegen_flags: <defaults>
</compile_context>

<pallas_src>
import numpy as np

import jax
import jax.numpy as jnp
from jax import lax
from jax.experimental import pallas as pl
from jax.experimental.pallas import tpu as pltpu


def _cdiv(a, b):
    return -(-a // b)


def _padded_bytes(shape, itemsize=4):
    """VMEM footprint of an array padded to native (sublane, 128) tiles."""
    shape = tuple(int(d) for d in shape)
    if len(shape) == 1:
        shape = (1,) + shape
    lead = 1
    for d in shape[:-2]:
        lead *= d
    sub_mult = 32 // itemsize                 # 8 for f32, 16 for bf16
    sub = _cdiv(shape[-2], sub_mult) * sub_mult
    lane = _cdiv(shape[-1], 128) * 128
    return itemsize * lead * sub * lane


def _vmem_capacity_bytes():
    """Per-core VMEM capacity; conservative 64 MiB (v7x) fallback if the query
    is unavailable in this JAX build (narrow fallback, no semantic change)."""
    try:
        cap = getattr(pltpu.get_tpu_info(), "vmem_capacity_bytes", None)
        if cap:
            return int(cap)
    except Exception:
        pass
    return 64 * 1024 * 1024


def lstm_losses(feats, hidden, seq_lens):
    """Equivalent of LSTMLosses.forward.

    feats:    (B, S, D)  float32 padded sequences (batch-first)
    hidden:   (B, S, 2D) float32, [..., :D] forward half, [..., D:] backward half
    seq_lens: list of static Python ints (PackedSequence lengths)
    returns:  (fw_loss, bw_loss), each shape (1,)
    """
    B, S, D = feats.shape
    H = hidden.shape[2]
    assert H == 2 * D, "hidden dim must be 2 * feat dim (fw + bw halves)"
    seq_lens = [int(l) for l in seq_lens]
    assert len(seq_lens) == B

    total_rows = sum(seq_lens) + 2 * B
    vmem_cap = _vmem_capacity_bytes()

    # ---- block sizing -------------------------------------------------------
    # >= 2 parallel batch blocks when B >= 2 (both v7x TensorCores get work);
    # bigger blocks on 128-MiB-VMEM chips (v5e/v6e) to amortize per-step cost.
    bt_cap = 8 if vmem_cap <= (64 << 20) else 16
    Bt = max(1, min(bt_cap, _cdiv(B, 2)))
    B_pad = _cdiv(B, Bt) * Bt
    n_blocks = B_pad // Bt
    rows = Bt * 2 * S                      # stacked (fw | bw) rows per grid step

    # R (candidate-row) tiling: bound the (rows, TR) f32 logits plane; the
    # online log-sum-exp accumulates across R tiles (innermost grid axis).
    plane_budget = 6 * 1024 * 1024         # target bytes per f32 (rows, TR) plane
    tr_cap = max(128, min(2048, (plane_budget // (rows * 4)) // 128 * 128))
    R_pad0 = _cdiv(total_rows, 128) * 128
    n_r = _cdiv(R_pad0, tr_cap)
    TR = _cdiv(_cdiv(R_pad0, n_r), 128) * 128
    R_pad = TR * n_r
    pad_count = R_pad - total_rows         # static; padded xvt columns are zero

    # ---- glue: packed x_values table (zero row | seq_i | zero row | ...) ----
    xv = jnp.zeros((R_pad, D), jnp.float32)
    start = 0
    for i, L in enumerate(seq_lens):
        if L > 0:
            xv = xv.at[start + 1:start + 1 + L, :].set(feats[i, :L, :])
        start += L + 2
    # bf16 table: half the DMA/VMEM, ~3x MXU; zero padding stays exactly zero
    # in bf16 (the invariant the pad_count LSE correction relies on).
    xvt = xv.T.astype(jnp.bfloat16)        # (D, R_pad), lane-dense candidates

    # ---- glue: diagonal ("picked") logits, pre-folded per sequence ----------
    # fw step t targets feats[:, t+1] (zero row at t = L-1); bw step t targets
    # feats[:, t-1] (zero row at t = 0).  Computed in f32 and folded with the
    # -1/L weights so the kernel never needs the targets.
    nxt = jnp.concatenate([feats[:, 1:, :], jnp.zeros((B, 1, D), feats.dtype)], axis=1)
    prv = jnp.concatenate([jnp.zeros((B, 1, D), feats.dtype), feats[:, :-1, :]], axis=1)
    picked_fw = jnp.einsum('btd,btd->bt', hidden[:, :, :D], nxt)   # (B, S)
    picked_bw = jnp.einsum('btd,btd->bt', hidden[:, :, D:], prv)   # (B, S)

    mfw = np.zeros((B, S), np.float32)               # picked-fold masks (w folded in)
    mbw = np.zeros((B, S), np.float32)
    w_np = np.zeros((B_pad, 2 * S), np.float32)      # per-row LSE weights (lane-dense)
    for i, L in enumerate(seq_lens):
        if L > 0:                                    # guards seq_len == 0
            if L > 1:
                mfw[i, :L - 1] = -1.0 / L            # t = L-1 target is the zero row
                mbw[i, 1:L] = -1.0 / L               # t = 0   target is the zero row
            w_np[i, :L] = -1.0 / L                   # fw rows
            w_np[i, S:S + L] = -1.0 / L              # bw rows
    picked_fold_fw = jnp.sum(picked_fw * jnp.asarray(mfw), axis=1)   # (B,)
    picked_fold_bw = jnp.sum(picked_bw * jnp.asarray(mbw), axis=1)   # (B,)
    w = jnp.asarray(w_np.reshape(n_blocks, Bt, 2 * S))

    # ---- stack fw/bw halves into the fused LHS: (B_pad, 2, S, D) ------------
    hid = jnp.stack([hidden[:, :, :D], hidden[:, :, D:]], axis=1)
    if B_pad > B:
        hid = jnp.concatenate(
            [hid, jnp.zeros((B_pad - B, 2, S, D), jnp.float32)], axis=0)

    def kernel(hid_ref, w_ref, xvt_ref, out_ref, m_sc, s_sc):
        r = pl.program_id(1)

        # Fused matmul for all Bt sequences x both directions: bf16 in, f32 acc.
        lhs = hid_ref[...].reshape(rows, D).astype(jnp.bfloat16)
        logits = jnp.dot(lhs, xvt_ref[...],
                         preferred_element_type=jnp.float32)        # (rows, TR)

        @pl.when(r == 0)
        def _():
            m_sc[...] = jnp.full_like(m_sc, -1e30)
            s_sc[...] = jnp.zeros_like(s_sc)

        # Online (flash-style) log-sum-exp over R tiles.
        tile_max = jnp.max(logits, axis=1, keepdims=True)            # (rows, 1)
        m_old = m_sc[...]
        m_new = jnp.maximum(m_old, tile_max)
        s_sc[...] = (jnp.exp(m_old - m_new) * s_sc[...]
                     + jnp.sum(jnp.exp(logits - m_new), axis=1, keepdims=True))
        m_sc[...] = m_new

        @pl.when(r == pl.num_programs(1) - 1)
        def _():
            m = m_sc[...]
            s = s_sc[...]
            if pad_count:      # static; padded zero columns each added exp(-m)
                s = s - float(pad_count) * jnp.exp(-m)
            lse = m + jnp.log(s)                                     # (rows, 1)
            contrib = lse.reshape(Bt, 2 * S, 1) * w_ref[0][:, :, None]
            fw_vals = jnp.sum(contrib[:, :S, :], axis=1)             # (Bt, 1)
            bw_vals = jnp.sum(contrib[:, S:, :], axis=1)             # (Bt, 1)
            lane = lax.broadcasted_iota(jnp.int32, (1, 128), 1)
            out_ref[0] = jnp.where(lane == 0, fw_vals,
                                   jnp.where(lane == 1, bw_vals, 0.0))

    # ---- VMEM budget (tile-padding aware), clamped to the chip generation ---
    vmem_est = (2 * _padded_bytes((D, TR), 2)            # xvt tiles (x2 buffers)
                + 2 * _padded_bytes((Bt, 2, S, D))       # hidden blocks
                + 2 * _padded_bytes((1, Bt, 2 * S))      # weight blocks
                + 2 * _padded_bytes((1, Bt, 128))        # output blocks
                + 2 * _padded_bytes((rows, 1))           # online-LSE scratch
                + 3 * _padded_bytes((rows, TR))          # logits + exp temps
                + _padded_bytes((rows, D), 2))           # bf16 lhs temp
    vmem_limit = int(min(0.85 * vmem_cap,
                         max(32 * 1024 * 1024, 2 * vmem_est)))

    grid_spec = pltpu.PrefetchScalarGridSpec(
        num_scalar_prefetch=0,
        grid=(n_blocks, n_r),
        in_specs=[
            pl.BlockSpec((Bt, 2, S, D), lambda g, r: (g, 0, 0, 0)),   # hidden
            pl.BlockSpec((1, Bt, 2 * S), lambda g, r: (g, 0, 0)),     # LSE weights
            pl.BlockSpec((D, TR), lambda g, r: (0, r)),               # xvt R tile
        ],
        out_specs=pl.BlockSpec((1, Bt, 128), lambda g, r: (g, 0, 0)),
        scratch_shapes=[pltpu.VMEM((rows, 1), jnp.float32),           # running max
                        pltpu.VMEM((rows, 1), jnp.float32)],          # running sumexp
    )

    per_block = pl.pallas_call(
        kernel,
        out_shape=jax.ShapeDtypeStruct((n_blocks, Bt, 128), jnp.float32),
        grid_spec=grid_spec,
        compiler_params=pltpu.CompilerParams(
            dimension_semantics=("parallel", "arbitrary"),
            vmem_limit_bytes=vmem_limit),
    )(hid, w, xvt)

    # Kernel lanes: 0 -> sum_t w*lse (fw), 1 -> sum_t w*lse (bw).  Per-seq loss
    # is (sum_t w*picked) - (sum_t w*lse); batch mean done here in JAX.
    per_seq = per_block.reshape(B_pad, 128)[:B]
    fw = ((jnp.sum(picked_fold_fw) - jnp.sum(per_seq[:, 0])) / B).reshape(1)
    bw = ((jnp.sum(picked_fold_bw) - jnp.sum(per_seq[:, 1])) / B).reshape(1)
    return fw, bw


def _reference(feats, hidden, seq_lens):
    feats = np.asarray(feats); hidden = np.asarray(hidden)
    B, S, D = feats.shape
    total = int(sum(seq_lens)) + 2 * B
    xv = np.zeros((total, D), np.float32)
    start = 0
    for i, L in enumerate(seq_lens):
        xv[start + 1:start + 1 + L] = feats[i, :L]
        start += L + 2
    cum = [0]
    for L in seq_lens:
        cum.append(cum[-1] + int(L))

    def logsoftmax(x):
        m = x.max(axis=1, keepdims=True)
        return x - m - np.log(np.exp(x - m).sum(axis=1, keepdims=True))

    fw_loss = 0.0
    bw_loss = 0.0
    for i, L in enumerate(seq_lens):
        fw_h = hidden[i, :L, :D]
        bw_h = hidden[i, :L, D:]
        ss = 2 * i + cum[i]
        fw_lp = logsoftmax(fw_h @ xv.T)
        bw_lp = logsoftmax(bw_h @ xv.T)
        fw_loss += -np.mean([fw_lp[t, ss + 2 + t] for t in range(L)])
        bw_loss += -np.mean([bw_lp[t, ss + t] for t in range(L)])
    return np.float32(fw_loss / B), np.float32(bw_loss / B)


if __name__ == "__main__":
    key = jax.random.PRNGKey(0)
    B, S, D = 2, 8, 32          # batch, max_seq_len, feat dim; hidden dim = 2*D = 64
    seq_lens = [8, 5]
    k1, k2 = jax.random.split(key)
    feats = jax.random.normal(k1, (B, S, D), dtype=jnp.float32)
    hidden = jax.random.normal(k2, (B, S, 2 * D), dtype=jnp.float32)

    fw, bw = lstm_losses(feats, hidden, seq_lens)
    jax.block_until_ready((fw, bw))

    fw_ref, bw_ref = _reference(feats, hidden, seq_lens)
    # bf16 MXU inputs (f32 accumulation) -> loss-level tolerance is relaxed vs
    # the all-f32 numpy reference.
    np.testing.assert_allclose(np.asarray(fw)[0], fw_ref, rtol=2e-2, atol=2e-2)
    np.testing.assert_allclose(np.asarray(bw)[0], bw_ref, rtol=2e-2, atol=2e-2)

    print("KERNEL_OK")
</pallas_src>

<mosaic_0001>
module attributes {stable_mosaic.version = 11 : i64} {
  func.func @kernel(%arg0: i32, %arg1: i32, %arg2: memref<1x2x8x32xf32, #tpu.memory_space<vmem>>, %arg3: memref<1x1x16xf32, #tpu.memory_space<vmem>>, %arg4: memref<32x128xbf16, #tpu.memory_space<vmem>>, %arg5: memref<1x1x128xf32, #tpu.memory_space<vmem>>, %arg6: memref<16x1xf32, #tpu.memory_space<vmem>>, %arg7: memref<16x1xf32, #tpu.memory_space<vmem>>) attributes {dimension_semantics = [#tpu.dimension_semantics<parallel>, #tpu.dimension_semantics<arbitrary>], iteration_bounds = array<i64: 2, 1>, scalar_prefetch = 0 : i64, scratch_operands = 2 : i64, tpu.core_type = #tpu.core_type<tc>, window_params = [{transform_indices = @transform_0, window_bounds = array<i64: 1, 2, 8, 32>}, {transform_indices = @transform_1, window_bounds = array<i64: 1, 1, 16>}, {transform_indices = @transform_2, window_bounds = array<i64: 32, 128>}, {transform_indices = @transform_3, window_bounds = array<i64: 1, 1, 128>}]} {
    %c0 = arith.constant 0 : index
    %c0_0 = arith.constant 0 : index
    %c0_1 = arith.constant 0 : index
    %c0_2 = arith.constant 0 : index
    %0 = vector.load %arg2[%c0, %c0_0, %c0_1, %c0_2] : memref<1x2x8x32xf32, #tpu.memory_space<vmem>>, vector<1x2x8x32xf32>
    %1 = vector.shape_cast %0 : vector<1x2x8x32xf32> to vector<16x32xf32>
    %2 = arith.truncf %1 : vector<16x32xf32> to vector<16x32xbf16>
    %c0_3 = arith.constant 0 : index
    %c0_4 = arith.constant 0 : index
    %3 = vector.load %arg4[%c0_3, %c0_4] : memref<32x128xbf16, #tpu.memory_space<vmem>>, vector<32x128xbf16>
    %cst = arith.constant dense<0.000000e+00> : vector<16x128xf32>
    %4 = tpu.matmul %2, %3, %cst {dimension_numbers = #tpu.dot_dimension_numbers<[1], [0], [0], [1], [0, 0, 1, 1], [], []>} : vector<16x32xbf16>, vector<32x128xbf16>, vector<16x128xf32> -> vector<16x128xf32>
    %c0_i32 = arith.constant 0 : i32
    %5 = arith.cmpi eq, %arg1, %c0_i32 : i32
    %6 = arith.extui %5 : i1 to i32
    %c0_i32_5 = arith.constant 0 : i32
    %7 = arith.cmpi ne, %6, %c0_i32_5 : i32
    scf.if %7 {
      %cst_18 = arith.constant -1.000000e+30 : f32
      %27 = vector.broadcast %cst_18 : f32 to vector<16x1xf32>
      %c0_19 = arith.constant 0 : index
      %c0_20 = arith.constant 0 : index
      %28 = vector.load %arg6[%c0_19, %c0_20] : memref<16x1xf32, #tpu.memory_space<vmem>>, vector<16x1xf32>
      tpu.vector_store %arg6[%c0_19, %c0_20], %27 {strides = array<i32>} : memref<16x1xf32, #tpu.memory_space<vmem>>, vector<16x1xf32>,
      %cst_21 = arith.constant 0.000000e+00 : f32
      %29 = vector.broadcast %cst_21 : f32 to vector<16x1xf32>
      %c0_22 = arith.constant 0 : index
      %c0_23 = arith.constant 0 : index
      %30 = vector.load %arg7[%c0_22, %c0_23] : memref<16x1xf32, #tpu.memory_space<vmem>>, vector<16x1xf32>
      tpu.vector_store %arg7[%c0_22, %c0_23], %29 {strides = array<i32>} : memref<16x1xf32, #tpu.memory_space<vmem>>, vector<16x1xf32>,
    } else {
    }
    %cst_6 = arith.constant dense<0xFF800000> : vector<16xf32>
    %8 = vector.multi_reduction <maximumf>, %4, %cst_6 [1] : vector<16x128xf32> to vector<16xf32>
    %9 = vector.shape_cast %8 : vector<16xf32> to vector<16x1xf32>
    %c0_7 = arith.constant 0 : index
    %c0_8 = arith.constant 0 : index
    %10 = vector.load %arg6[%c0_7, %c0_8] : memref<16x1xf32, #tpu.memory_space<vmem>>, vector<16x1xf32>
    %11 = arith.maximumf %10, %9 : vector<16x1xf32>
    %12 = arith.subf %10, %11 : vector<16x1xf32>
    %13 = math.exp %12 : vector<16x1xf32>
    %c0_9 = arith.constant 0 : index
    %c0_10 = arith.constant 0 : index
    %14 = vector.load %arg7[%c0_9, %c0_10] : memref<16x1xf32, #tpu.memory_space<vmem>>, vector<16x1xf32>
    %15 = arith.mulf %13, %14 : vector<16x1xf32>
    %16 = vector.broadcast %11 : vector<16x1xf32> to vector<16x128xf32>
    %17 = arith.subf %4, %16 : vector<16x128xf32>
    %18 = math.exp %17 : vector<16x128xf32>
    %cst_11 = arith.constant dense<0.000000e+00> : vector<16xf32>
    %19 = vector.multi_reduction <add>, %18, %cst_11 [1] : vector<16x128xf32> to vector<16xf32>
    %20 = vector.shape_cast %19 : vector<16xf32> to vector<16x1xf32>
    %21 = arith.addf %15, %20 : vector<16x1xf32>
    %c0_12 = arith.constant 0 : index
    %c0_13 = arith.constant 0 : index
    %22 = vector.load %arg7[%c0_12, %c0_13] : memref<16x1xf32, #tpu.memory_space<vmem>>, vector<16x1xf32>
    tpu.vector_store %arg7[%c0_12, %c0_13], %21 {strides = array<i32>} : memref<16x1xf32, #tpu.memory_space<vmem>>, vector<16x1xf32>,
    %c0_14 = arith.constant 0 : index
    %c0_15 = arith.constant 0 : index
    %23 = vector.load %arg6[%c0_14, %c0_15] : memref<16x1xf32, #tpu.memory_space<vmem>>, vector<16x1xf32>
    tpu.vector_store %arg6[%c0_14, %c0_15], %11 {strides = array<i32>} : memref<16x1xf32, #tpu.memory_space<vmem>>, vector<16x1xf32>,
    %c0_i32_16 = arith.constant 0 : i32
    %24 = arith.cmpi eq, %arg1, %c0_i32_16 : i32
    %25 = arith.extui %24 : i1 to i32
    %c0_i32_17 = arith.constant 0 : i32
    %26 = arith.cmpi ne, %25, %c0_i32_17 : i32
    scf.if %26 {
      %c0_18 = arith.constant 0 : index
      %c0_19 = arith.constant 0 : index
      %27 = vector.load %arg6[%c0_18, %c0_19] : memref<16x1xf32, #tpu.memory_space<vmem>>, vector<16x1xf32>
      %c0_20 = arith.constant 0 : index
      %c0_21 = arith.constant 0 : index
      %28 = vector.load %arg7[%c0_20, %c0_21] : memref<16x1xf32, #tpu.memory_space<vmem>>, vector<16x1xf32>
      %cst_22 = arith.constant 0.000000e+00 : f32
      %29 = vector.broadcast %cst_22 : f32 to vector<16x1xf32>
      %30 = arith.subf %29, %27 : vector<16x1xf32>
      %31 = math.exp %30 : vector<16x1xf32>
      %cst_23 = arith.constant 1.110000e+02 : f32
      %32 = vector.broadcast %cst_23 : f32 to vector<16x1xf32>
      %33 = arith.mulf %32, %31 : vector<16x1xf32>
      %34 = arith.subf %28, %33 : vector<16x1xf32>
      %35 = math.log %34 : vector<16x1xf32>
      %36 = arith.addf %27, %35 : vector<16x1xf32>
      %37 = vector.shape_cast %36 : vector<16x1xf32> to vector<1x16x1xf32>
      %c0_24 = arith.constant 0 : index
      %c0_25 = arith.constant 0 : index
      %c0_26 = arith.constant 0 : index
      %38 = vector.load %arg3[%c0_24, %c0_25, %c0_26] : memref<1x1x16xf32, #tpu.memory_space<vmem>>, vector<1x1x16xf32>
      %39 = vector.shape_cast %38 : vector<1x1x16xf32> to vector<1x16xf32>
      %40 = vector.shape_cast %39 : vector<1x16xf32> to vector<1x16x1xf32>
      %41 = arith.mulf %37, %40 : vector<1x16x1xf32>
      %42 = vector.extract_strided_slice %41 {offsets = [0, 0, 0], sizes = [1, 8, 1], strides = [1, 1, 1]} : vector<1x16x1xf32> to vector<1x8x1xf32>
      %cst_27 = arith.constant dense<0.000000e+00> : vector<1x1xf32>
      %43 = vector.multi_reduction <add>, %42, %cst_27 [1] : vector<1x8x1xf32> to vector<1x1xf32>
      %44 = vector.extract_strided_slice %41 {offsets = [0, 8, 0], sizes = [1, 8, 1], strides = [1, 1, 1]} : vector<1x16x1xf32> to vector<1x8x1xf32>
      %cst_28 = arith.constant dense<0.000000e+00> : vector<1x1xf32>
      %45 = vector.multi_reduction <add>, %44, %cst_28 [1] : vector<1x8x1xf32> to vector<1x1xf32>
      %46 = tpu.iota {dimensions = array<i32: 1>} : vector<1x128xi32>
      %c0_i32_29 = arith.constant 0 : i32
      %47 = vector.broadcast %c0_i32_29 : i32 to vector<1x128xi32>
      %48 = arith.cmpi eq, %46, %47 : vector<1x128xi32>
      %c1_i32 = arith.constant 1 : i32
      %49 = vector.broadcast %c1_i32 : i32 to vector<1x128xi32>
      %50 = arith.cmpi eq, %46, %49 : vector<1x128xi32>
      %cst_30 = arith.constant 0.000000e+00 : f32
      %51 = vector.shape_cast %45 : vector<1x1xf32> to vector<1x1xf32>
      %52 = vector.broadcast %51 : vector<1x1xf32> to vector<1x128xf32>
      %53 = vector.broadcast %cst_30 : f32 to vector<1x128xf32>
      %54 = arith.select %50, %52, %53 : vector<1x128xi1>, vector<1x128xf32>
      %55 = vector.shape_cast %43 : vector<1x1xf32> to vector<1x1xf32>
      %56 = vector.broadcast %55 : vector<1x1xf32> to vector<1x128xf32>
      %57 = arith.select %48, %56, %54 : vector<1x128xi1>, vector<1x128xf32>
      %c0_31 = arith.constant 0 : index
      %c0_32 = arith.constant 0 : index
      %c0_33 = arith.constant 0 : index
      %58 = vector.load %arg5[%c0_31, %c0_32, %c0_33] : memref<1x1x128xf32, #tpu.memory_space<vmem>>, vector<1x1x128xf32>
      %59 = vector.shape_cast %58 : vector<1x1x128xf32> to vector<1x128xf32>
      %60 = vector.shape_cast %57 : vector<1x128xf32> to vector<1x1x128xf32>
      tpu.vector_store %arg5[%c0_31, %c0_32, %c0_33], %60 {strides = array<i32>} : memref<1x1x128xf32, #tpu.memory_space<vmem>>, vector<1x1x128xf32>,
    } else {
    }
    return
  }
  func.func @transform_0(%arg0: i32, %arg1: i32) -> (i32, i32, i32, i32) {
    %c0_i32 = arith.constant 0 : i32
    %c0_i32_0 = arith.constant 0 : i32
    %c0_i32_1 = arith.constant 0 : i32
    %c0_i32_2 = arith.constant 0 : i32
    return %arg0, %c0_i32, %c0_i32_0, %c0_i32_1 : i32, i32, i32, i32
  }
  func.func @transform_1(%arg0: i32, %arg1: i32) -> (i32, i32, i32) {
    %c0_i32 = arith.constant 0 : i32
    %c0_i32_0 = arith.constant 0 : i32
    %c0_i32_1 = arith.constant 0 : i32
    return %arg0, %c0_i32, %c0_i32_0 : i32, i32, i32
  }
  func.func @transform_2(%arg0: i32, %arg1: i32) -> (i32, i32) {
    %c0_i32 = arith.constant 0 : i32
    %c0_i32_0 = arith.constant 0 : i32
    return %c0_i32, %arg1 : i32, i32
  }
  func.func @transform_3(%arg0: i32, %arg1: i32) -> (i32, i32, i32) {
    %c0_i32 = arith.constant 0 : i32
    %c0_i32_0 = arith.constant 0 : i32
    %c0_i32_1 = arith.constant 0 : i32
    return %arg0, %c0_i32, %c0_i32_0 : i32, i32, i32
  }
}

</mosaic_0001>

<bundles_post_ra>
// kernel: tpu_custom_call.1
= control target key start
LH: loop header
LB: loop body
LE: loop exit
PB: predicated region body
PF: predicated region fallthrough
CT: control target
= control target key end

     0   :  { %8 = vsyncpa [#allocation5], 0  ;;  %s1072_s0 = inlined_call_operand.hbm [shape: f32[2,2,8,32], index: 0, kind: input, shape index: {}]   ;;  %s1073_s1 = inlined_call_operand.vmem [shape: f32[2,1,16], index: 1, kind: input, shape index: {}]   ;;  %s1074_s2 = inlined_call_operand.hbm [shape: bf16[32,128], index: 2, kind: input, shape index: {}]   ;;  %s1075_s3 = inlined_call_operand.hbm [shape: f32[2,1,128], index: 3, kind: output, shape index: {}]  }
   0x1   :  { %10 = vsyncpa [#allocation5 + $0x1], 0 }
   0x2   :  { %11 = vsyncpa [#allocation8], 0 }
   0x3   :  { %12 = vsyncpa [#allocation6], 0 }
   0x4   :  { %14 = vsyncpa [#allocation6 + $0x1], 0  ;;  %s839_s12 = smov 0   ;;  %s841_s13 = smov 0  }
   0x5   :  { %s843_s14 = smov 0   ;;  %s845_s15 = smov 0  }
   0x6   :  { %s847_s16 = smov 0   ;;  %s849_s17 = smov 0  }
   0x7 LB: > { %s531_s18 = sadd.s32 4294967295, %s806_s17   ;;  %s532_s19 = sadd.s32 4294967294, %s806_s17   ;;  %s806_s17 = sphi %s849_s17, %s20_s17   ;;  %s802_s16 = sphi %s847_s16, %s1099_s16   ;;  %s798_s15 = sphi %s845_s15, %s1098_s15   ;;  %s794_s14 = sphi %s843_s14, %s1097_s14   ;;  %s790_s13 = sphi %s841_s13, %s1096_s13   ;;  %s786_s12 = sphi %s839_s12, %s1095_s12  }
   0x8   : > { %p52_p0 = scmp.ne.s32.totalorder %s790_s13, %s786_s12  ;;  %p873_p1 = scmp.eq.s32.totalorder %s531_s18, 0 }
   0x9   : > { %p877_p2 = scmp.eq.s32.totalorder %s531_s18, 1  ;;  %p134_p3 = scmp.eq.s32.totalorder %s532_s19, 1 }
   0xa   : > { %s1080_s20 = scalar_select %p873_p1, 1, 0 }
   0xb   : > { %s1081_s21 = scalar_select %p877_p2, 1, 0 }
   0xc   : > { %p883_p4 = por %p873_p1, %p52_p0  ;;  %p533_p5 = scmp.ge.s32.totalorder %s806_s17, 1 }
   0xd   : > { %p888_p6 = por %p134_p3, %p52_p0  ;;  %p141_p7 = scmp.lt.s32.totalorder %s806_s17, 3 }
   0xe   : > { %s1082_s22 = scalar_select %p883_p4, 1, 0 }
   0xf   : > { %s1083_s23 = scalar_select %p888_p6, 1, 0 }
  0x10   : > { %p893_p8 = pnand %p533_p5, %p141_p7  ;;  %s808_s25 = smov [#allocation7]  }
  0x11   : > { %s155_s26 = sshll.u32 %s808_s25, 4  ;;  %s32_s28 = sadd.s32 1, %s802_s16  ;;  %s156_s26 = int_to_ptr.vmem [resolvable:$true] %s155_s26 }
  0x12   : > { %s1084_s24 = scalar_select %p893_p8, 1, 0 }
  0x13   : > { %p569_p9 = pneg %p893_p8  ;;  %s662_s4 = scalar_lea.hbm %s1074_s2, 256 }
  0x14   : > { %p663_p12 = scmp.ne.s32.totalorder %s1074_s2, %s662_s4  ;;  %p669_p5 = scmp.lt.u32.totalorder %s662_s4, %s1074_s2 }
  0x15   : > { %p902_p11 = pnand %p569_p9, %p873_p1 }
  0x17   : > { %p664_p13 = pneg %p902_p11 }
  0x19   : > { %p665_p0 = pnand %p664_p13, %p663_p12 }
  0x1b   : > { %p666_p3 = pneg %p665_p0 }
  0x1d   : > { %p671_p7 = pnand %p669_p5, %p666_p3 }
  0x1f   : > { %674 = shalt.err (!%p671_p7)
}
  0x20   : > { %s675_s9 = scalar_lea.vmem %s156_s26, 256  ;;  %p683_p1 = scmp.lt.s32.totalorder %s156_s26, %s156_s26 }
  0x21   : > { %p676_p9 = scmp.ne.s32.totalorder %s156_s26, %s675_s9  ;;  %p684_p4 = scmp.lt.s32.totalorder %s675_s9, %s675_s9 }
  0x23   : > { %p678_p10 = pnand %p676_p9, %p664_p13  ;;  %p685_p8 = por %p684_p4, %p683_p1 }
  0x25   : > { %p679_p6 = pneg %p678_p10 }
  0x27   : > { %p686_p2 = pnand %p685_p8, %p679_p6 }
  0x29   : > { %689 = shalt.err (!%p686_p2)
}
  0x2a   : > { %s809_s10 = smov 64   ;;  %s810_s11 = smov 4  }
  0x2b   : > { %572 = dma.hbm_to_vmem [thread:$0]  (!%p902_p11), %s1074_s2, 256, %s156_s26, [#allocation8], %s809_s10, %s809_s10, %s810_s11  }
  0x2c   : > { %p34_p1 = scmp.ge.s32.totalorder %s32_s28, 2  ;;  %s39_s25 = sadd.s32 1, %s794_s14 }
  0x2d   : > { %p46_p2 = scmp.ne.s32.totalorder %s794_s14, %s790_s13  ;;  %p47_p4 = scmp.eq.s32.totalorder %s806_s17, 0 }
  0x2e   : > { %s1101_s28 = smov (%p34_p1, %s32_s28), 0  ;;  %p1087_p8 = scmp.ne.s32.totalorder %s1081_s21, 0 }
  0x2f   : > { %p929_p6 = por %p47_p4, %p46_p2  ;;  %s36_s27 = ssub.s32 %s802_s16, %s1101_s28 }
  0x30   : > { %p935_p10 = por %p1087_p8, %p46_p2  ;;  %p582_p12 = scmp.lt.s32.totalorder %s806_s17, 2 }
  0x31   : > { %p37_p11 = scmp.eq.s32.totalorder %s36_s27, 0  ;;  %s169_s26 = sand.u32 1, %s794_s14  }
  0x32   : > { %s536_s4 = sshll.u32 %s169_s26, 4  ;;  %s549_s6 = sshll.u32 %s802_s16, 8 }
  0x33   : > { %s944_s5 = scalar_select %p37_p11, %s794_s14, %s39_s25  }
  0x34   : > { %s950_s9 = scalar_lea.hbm %s1072_s0, %s549_s6  ;;  %s173_s21 = scalar_lea.vmem [#allocation4], %s536_s4 }
  0x35   : > { %s180_s10 = sshll.u32 %s173_s21, 4  ;;  %p956_p13 = pnand %p582_p12, %p929_p6  ;;  %s952_s10 = int_to_ptr.vmem [resolvable:$true] %s180_s10 }
  0x36   : > { %s960_s18 = scalar_lea.sflag [#allocation5], %s169_s26  ;;  %s690_s19 = scalar_lea.hbm %s950_s9, 256 }
  0x37   : > { %p691_p0 = scmp.ne.s32.totalorder %s950_s9, %s690_s19  ;;  %p692_p3 = pneg %p956_p13 }
  0x38   : > { %s695_s29 = scalar_lea.hbm %s1072_s0, 512  ;;  %p696_p9 = scmp.lt.u32.totalorder %s950_s9, %s1072_s0 }
  0x39   : > { %p693_p5 = pnand %p692_p3, %p691_p0  ;;  %p697_p1 = scmp.lt.u32.totalorder %s695_s29, %s690_s19 }
  0x3a   : > { %p699_p4 = scmp.lt.u32.totalorder %s690_s19, %s950_s9 }
  0x3b   : > { %p694_p7 = pneg %p693_p5  ;;  %p698_p2 = por %p697_p1, %p696_p9 }
  0x3d   : > { %p700_p6 = por %p699_p4, %p698_p2 }
  0x3f   : > { %p701_p8 = pnand %p700_p6, %p694_p7 }
  0x41   : > { %704 = shalt.err (!%p701_p8)
}
  0x42   : > { %s705_s26 = scalar_lea.vmem %s952_s10, 256  ;;  %s811_s7 = smov [#allocation4]  }
  0x43   : > { %p706_p12 = scmp.ne.s32.totalorder %s952_s10, %s705_s26  ;;  %s710_s8 = sshll.u32 %s811_s7, 4  ;;  %s711_s8 = int_to_ptr.vmem [resolvable:$false] %s710_s8 }
  0x44   : > { %s712_s21 = scalar_lea.vmem %s711_s8, 512  ;;  %p713_p5 = scmp.lt.s32.totalorder %s952_s10, %s711_s8 }
  0x45   : > { %p708_p11 = pnand %p706_p12, %p692_p3  ;;  %p714_p9 = scmp.lt.s32.totalorder %s712_s21, %s705_s26 }
  0x47   : > { %p709_p0 = pneg %p708_p11  ;;  %p715_p1 = por %p714_p9, %p713_p5 }
  0x49   : > { %p716_p2 = pnand %p715_p1, %p709_p0 }
  0x4b   : > { %719 = shalt.err (!%p716_p2)
}
  0x4c   : > { %s812_s19 = smov 128   ;;  %s813_s25 = smov 8  }
  0x4d   : > { %576 = dma.hbm_to_vmem [thread:$0]  (!%p956_p13), %s950_s9, 256, %s952_s10, %s960_s18, %s812_s19, %s812_s19, %s813_s25  }
  0x4e   : > { %p1090_p3 = scmp.ne.s32.totalorder %s1084_s24, 0 }
  0x4f   : > { %s991_s27 = sand.u32 (!%p1090_p3), 1, %s790_s13   ;;  %p1091_p7 = scmp.ne.s32.totalorder (!%p1090_p3), %s1082_s22, 0 }
  0x50   : > { %198 = sbr.rel (%p1090_p3) target bundleno = 932 (0x3a4), region = 32  ;;  %s540_s29 = sshll.u32 (!%p1090_p3), %s991_s27, 4 }
  0x51   : > { %s201_s4 = scalar_lea.sflag (!%p1090_p3), [#allocation5], %s991_s27  ;;  %s204_s6 = scalar_lea.vmem (!%p1090_p3), [#allocation4], %s540_s29 }
  0x57   : > { %773 = dma.done.wait (%p1091_p7), %s201_s4, 256  }
  0x58   : > { %775 = vsyncadd (%p1091_p7), %s201_s4, 4294967040  ;;  %p1092_p4 = scmp.ne.s32.totalorder %s1080_s20, 0 }
  0x5a   : > { %777 = dma.done.wait (%p1092_p4), [#allocation8], 256  }
  0x5b   : > { %779 = vsyncadd (%p1092_p4), [#allocation8], 4294967040  ;;  %vm305_vm0 = vcmask 7168   ;;  %v814_v0 = vmov 0.0   ;;  %vm815_vm1 = vmmov 0   ;;  %v644_v1 = vld [vmem:[#allocation7] sm:$0xff]  }
  0x5c   : > { %553 = vmatprep.subr.bf16.mxu0 %v814_v0  ;;  %308 = vst.msk [vmem:[#allocation3] sm:$0xff] %vm305_vm0, %v814_v0  ;;  %309 = vst.msk [vmem:[#allocation3 + $0x8] sm:$0xff] %vm305_vm0, %v814_v0  ;;  %557 = vmatprep.mubr.msk.bf16.mxu0 %vm815_vm1, %v814_v0  ;;  %v645_v2 = vld [vmem:[#allocation7 + $0x8] sm:$0xff]   ;;  %v237_v3 = vld [vmem:[%s204_s6] sm:$0xff]  ;;  %vm256_vm2 = vcmask 261120   ;;  %v817_v11 = vmov 0  }
  0x5d   : > { %554 = vmatpush3.bf16.msra.mxu0 %v644_v1  ;;  %v238_v4 = vld [vmem:[%s204_s6 + $0x8] sm:$0xff]  ;;  %v816_v6 = vmov -1e+30   ;;  %642 = vset.pattern.permute.xlu1 %v817_v11  ;;  %p233_p13 = scmp.lt.s32.totalorder %s798_s15, 1  ;;  %s546_s10 = sshll.u32 %s798_s15, 4 }
  0x5e   : > { %555 = vmatprep.subr.bf16.mxu0 %v814_v0  ;;  %v239_v5 = vpack.c.bf16 %v238_v4, %v237_v3  ;;  %307 = vst.msk [vmem:[#allocation2 + $0x8] sm:$0xff] %vm305_vm0, %v816_v6  ;;  %306 = vst.msk [vmem:[#allocation2] sm:$0xff] %vm305_vm0, %v816_v6  ;;  %643 = vset.pattern.permute.xlu0 %v817_v11  ;;  %s232_s11 = scalar_lea.vmem [#allocation9], %s991_s27  ;;  %s1023_s8 = scalar_lea.hbm %s1075_s3, %s546_s10 }
  0x5f   : > { %s234_s20 = scalar_select %p233_p13, %s798_s15, 1 }
  0x60   : > { %s436_s18 = sshll.u32 %s232_s11, 4  ;;  %s424_s21 = scalar_lea.sflag [#allocation6], %s991_s27  ;;  %s1025_s18 = int_to_ptr.vmem [resolvable:$true] %s436_s18 }
  0x61   : > { %556 = vmatpush3.bf16.msra.mxu0 %v645_v2  ;;  %s235_s9 = scalar_lea.vmem %s1073_s1, %s234_s20  ;;  %s720_s19 = scalar_lea.vmem %s1025_s18, 16 }
  0x62   : > { %v545_v28 = vld [vmem:[%s235_s9] ss:$0 sm:$0xff]  ;;  %p721_p6 = scmp.ne.s32.totalorder %s1025_s18, %s720_s19  ;;  %s818_s15 = smov [#allocation9]  }
  0x63   : > { %v325_v37 = vld [vmem:[#allocation3 + $0x8] sm:$0xff]  ;;  %v324_v42 = vld [vmem:[#allocation3] sm:$0xff]  ;;  %s724_s25 = sshll.u32 %s818_s15, 4  ;;  %s725_s25 = int_to_ptr.vmem [resolvable:$false] %s724_s25 }
  0x64   : > { %558 = vmatmul.mubr.msk.bf16.vlgmr.msra.gmra.mrb[0].mxu0 %vm256_vm2, %v239_v5  ;;  %p722_p8 = pnand %p721_p6, %p935_p10  ;;  %s726_s29 = scalar_lea.vmem %s725_s25, 32 }
  0x65   : > { %v315_v12 = vld [vmem:[#allocation2 + $0x8] sm:$0xff]  ;;  %v314_v15 = vld [vmem:[#allocation2] sm:$0xff]  ;;  %p727_p11 = scmp.lt.s32.totalorder %s1025_s18, %s725_s25  ;;  %p728_p0 = scmp.lt.s32.totalorder %s726_s29, %s720_s19 }
  0x66   : > { %p723_p12 = pneg %p722_p8 }
  0x67   : > { %p729_p5 = por %p728_p0, %p727_p11 }
  0x69   : > { %p730_p9 = pnand %p729_p5, %p723_p12 }
 0x137   : > { %v294_v7 = vpop.f32.mrb[0].mxu0 }
 0x138   : > { %v559_v8 = vpop.f32.mrb[1].mxu0 }
 0x139   : > { %v297_v9 = vpop.f32.mrb[2].mxu0 }
 0x13a   : > { %312 = vmax.xlane.f32.xlu0 %v297_v9  ;;  %v560_v10 = vpop.f32.mrb[3].mxu0 }
 0x13e   : > { %310 = vmax.xlane.f32.xlu0 %v294_v7 }
 0x1c7   : > { %v313_v13 = vpop.xlane.xlu0 %312 }
 0x1c8   : > { %v317_v14 = vmax.f32 %v315_v12, %v313_v13 }
 0x1ca   : > { %v319_v16 = vsub.f32 %v315_v12, %v317_v14  ;;  %354 = vst.msk [vmem:[#allocation2 + $0x8] sm:$0xff] %vm305_vm0, %v317_v14  ;;  %335 = vperm.xlu1 %642, %v317_v14  }
 0x1cb   : > { %v311_v17 = vpop.xlane.xlu0 %310 }
 0x1cc   : > { %v316_v18 = vmax.f32 %v314_v15, %v311_v17  ;;  %v322_v29 = vmul.f32 1.442695, %v319_v16 }
 0x1ce   : > { %v318_v19 = vsub.f32 %v314_v15, %v316_v18  ;;  %353 = vst.msk [vmem:[#allocation2] sm:$0xff] %vm305_vm0, %v316_v18  ;;  %330 = vperm.xlu1 %642, %v316_v18   ;;  %v406_v15 = vlaneseq }
 0x1d0   : > { %v320_v31 = vmul.f32 1.442695, %v318_v19  ;;  %v407_v16 = vand.u32 127, %v406_v15 }
 0x1d1   : > { %v359_v30 = vld [vmem:[#allocation2 + $0x8] sm:$0xff] }
 0x1d2   : > { %v363_v32 = vsub.f32 0.0, %v359_v30  ;;  %vm409_vm3 = vcmp.eq.s32.totalorder %v407_v16, 1  ;;  %vm408_vm4 = vcmp.eq.s32.totalorder %v407_v16, 0 }
 0x1d4   : > { %v366_v34 = vmul.f32 1.442695, %v363_v32 }
 0x1d5   : > { %v358_v33 = vld [vmem:[#allocation2] sm:$0xff] }
 0x1d6   : > { %v362_v35 = vsub.f32 0.0, %v358_v33 }
 0x1d8   : > { %v364_v38 = vmul.f32 1.442695, %v362_v35 }
 0x249   : > { %v336_v20 = vpop.permute.xlu1 %335 }
 0x24a   : > { %v339_v21 = vsub.f32 %v297_v9, %v336_v20 }
 0x24c   : > { %v342_v22 = vmul.f32 1.442695, %v339_v21 }
 0x24d   : > { %v331_v23 = vpop.permute.xlu1 %330 }
 0x24e   : > { %646 = vpow2.f32 %v342_v22  ;;  %v338_v24 = vsub.f32 %v294_v7, %v331_v23 }
 0x250   : > { %v340_v25 = vmul.f32 1.442695, %v338_v24 }
 0x252   : > { %648 = vpow2.f32 %v340_v25 }
 0x253   : > { %650 = vpow2.f32 %v322_v29 }
 0x254   : > { %652 = vpow2.f32 %v320_v31 }
 0x255   : > { %654 = vpow2.f32 %v366_v34 }
 0x256   : > { %656 = vpow2.f32 %v364_v38 }
 0x258   : > { %v647_v26 = vpop.eup %646 }
 0x259   : > { %346 = vadd.xlane.f32.xlu0 %v647_v26 }
 0x25c   : > { %v649_v27 = vpop.eup %648 }
 0x25d   : > { %344 = vadd.xlane.f32.xlu1 %v649_v27  ;;  %v651_v36 = vpop.eup %650 }
 0x25e   : > { %v327_v39 = vmul.f32 %v651_v36, %v325_v37  ;;  %v653_v40 = vpop.eup %652 }
 0x25f   : > { %v326_v44 = vmul.f32 %v653_v40, %v324_v42  ;;  %v655_v47 = vpop.eup %654 }
 0x260   : > { %v369_v48 = vmul.f32 111.0, %v655_v47  ;;  %v657_v49 = vpop.eup %656 }
 0x261   : > { %v368_v52 = vmul.f32 111.0, %v657_v49 }
 0x26f   : > { %388 = vbcast.lane.b32.xlu0 %v545_v28, 264 }
 0x273   : > { %384 = vbcast.lane.b32.xlu0 %v545_v28, 256 }
 0x2e6   : > { %v347_v41 = vpop.xlane.xlu0 %346 }
 0x2e7   : > { %v349_v43 = vadd.f32 %v347_v41, %v327_v39 }
 0x2e9   : > { %352 = vst.msk [vmem:[#allocation3 + $0x8] sm:$0xff] %vm305_vm0, %v349_v43 }
 0x2ea   : > { %v345_v45 = vpop.xlane.xlu1 %344  ;;  %v389_v56 = vpop.permute.xlu0 %388 }
 0x2eb   : > { %v348_v46 = vadd.f32 %v345_v45, %v326_v44 }
 0x2ed   : > { %351 = vst.msk [vmem:[#allocation3] sm:$0xff] %vm305_vm0, %v348_v46 }
 0x2ee   : > { %v385_v62 = vpop.permute.xlu0 %384 }
 0x2f0   : > { %v361_v50 = vld [vmem:[#allocation3 + $0x8] sm:$0xff] }
 0x2f1   : > { %v371_v51 = vsub.f32 %v361_v50, %v369_v48 }
 0x2f3   : > { %658 = vlog2.f32 %v371_v51 }
 0x2f4   : > { %v360_v53 = vld [vmem:[#allocation3] sm:$0xff] }
 0x2f5   : > { %v370_v54 = vsub.f32 %v360_v53, %v368_v52 }
 0x2f7   : > { %660 = vlog2.f32 %v370_v54 }
 0x2fd   : > { %v659_v55 = vpop.eup %658 }
 0x2fe   : > { %v375_v57 = vmul.f32 0.6931472, %v659_v55 }
 0x300   : > { %v377_v58 = vadd.f32 %v375_v57, %v359_v30 }
 0x301   : > { %v661_v59 = vpop.eup %660 }
 0x302   : > { %v391_v60 = vmul.f32 %v389_v56, %v377_v58  ;;  %v373_v61 = vmul.f32 0.6931472, %v661_v59 }
 0x304   : > { %v399_v63 = vsel %vm305_vm0, %v391_v60, 0.0  ;;  %v376_v0 = vadd.f32 %v373_v61, %v358_v33 }
 0x305   : > { %v400_v1 = vrot.slane %v399_v63, 4 }
 0x306   : > { %v390_v2 = vmul.f32 %v385_v62, %v376_v0 }
 0x307   : > { %v401_v3 = vadd.f32 %v400_v1, %v399_v63 }
 0x308   : > { %v392_v4 = vsel %vm305_vm0, %v390_v2, 0.0 }
 0x309   : > { %v402_v5 = vrot.slane %v401_v3, 2  ;;  %v393_v6 = vrot.slane %v392_v4, 4 }
 0x30b   : > { %v403_v7 = vadd.f32 %v402_v5, %v401_v3  ;;  %v394_v8 = vadd.f32 %v393_v6, %v392_v4 }
 0x30d   : > { %v395_v9 = vrot.slane %v394_v8, 2  ;;  %v404_v10 = vrot.slane %v403_v7, 1 }
 0x30f   : > { %v396_v11 = vadd.f32 %v395_v9, %v394_v8  ;;  %v405_v12 = vadd.f32 %v404_v10, %v403_v7 }
 0x311   : > { %412 = vperm.xlu0 %643, %v405_v12   ;;  %v397_v13 = vrot.slane %v396_v11, 1 }
 0x313   : > { %v398_v14 = vadd.f32 %v397_v13, %v396_v11 }
 0x315   : > { %418 = vperm.xlu1 %642, %v398_v14  }
 0x390   : > { %v413_v17 = vpop.permute.xlu0 %412 }
 0x391   : > { %v415_v18 = vsel %vm409_vm3, %v413_v17, 0.0 }
 0x394   : > { %v419_v19 = vpop.permute.xlu1 %418 }
 0x395   : > { %v421_v20 = vsel %vm408_vm4, %v419_v19, %v415_v18 }
 0x396   : > { %422 = vst [vmem:[%s232_s11] sm:$0x1] %v421_v20 }
 0x397   : > { %733 = shalt.err (!%p730_p9)
}
 0x398   : > { %s734_s27 = scalar_lea.hbm %s1023_s8, 16  ;;  %s738_s20 = scalar_lea.hbm %s1075_s3, 32 }
 0x399   : > { %p735_p1 = scmp.ne.s32.totalorder %s1023_s8, %s734_s27  ;;  %p739_p7 = scmp.lt.u32.totalorder %s1023_s8, %s1075_s3 }
 0x39a   : > { %p740_p4 = scmp.lt.u32.totalorder %s738_s20, %s734_s27  ;;  %p742_p6 = scmp.lt.u32.totalorder %s734_s27, %s1023_s8 }
 0x39b   : > { %p736_p2 = pnand %p735_p1, %p935_p10 }
 0x39c   : > { %p741_p13 = por %p740_p4, %p739_p7 }
 0x39d   : > { %p737_p3 = pneg %p736_p2 }
 0x39e   : > { %p743_p8 = por %p742_p6, %p741_p13 }
 0x3a0   : > { %p744_p12 = pnand %p743_p8, %p737_p3 }
 0x3a2   : > { %747 = shalt.err (!%p744_p12)
}
 0x3a3   : > { %567 = dma.vmem_to_hbm [thread:$0]  (%p935_p10), %s1025_s18, 16, %s1023_s8, %s424_s21  }
 0x3a4 PF: > { %s448_s9 = sand.u32 1, %s786_s12   ;;  %p1093_p11 = scmp.ne.s32.totalorder %s1083_s23, 0 }
 0x3a5   : > { %p1094_p0 = scmp.ge.s32.totalorder %s806_s17, 2  ;;  %s449_s10 = scalar_lea.sflag [#allocation6], %s448_s9 }
 0x3a7   : > { %p578_p5 = pnand %p1094_p0, %p1093_p11 }
 0x3a9   : > { %781 = dma.done.wait (!%p578_p5), %s449_s10, 16  }
 0x3aa   : > { %783 = vsyncadd (!%p578_p5), %s449_s10, 4294967280  ;;  %s20_s17 = sadd.s32 1, %s806_s17   ;;  %s1095_s12 = smov %s790_s13 }
 0x3ab   : > { %p17_p9 = scmp.ge.s32.totalorder %s20_s17, 4   ;;  %s1096_s13 = smov %s794_s14 }
 0x3ac   : > { %s1097_s14 = smov %s944_s5  ;;  %s1098_s15 = smov %s802_s16 }
 0x3ad   : > { %s1099_s16 = smov %s1101_s28  ;;  %19 = sbr.rel (!%p17_p9) target bundleno = 7 (0x7), region = 93 }
 0x3b4   :  { %453 = vsyncpa [#allocation5], 1 }
 0x3b5   :  { %455 = vsyncpa [#allocation5 + $0x1], 1 }
 0x3b6   :  { %456 = vsyncpa [#allocation8], 1 }
 0x3b7   :  { %457 = vsyncpa [#allocation6], 1 }
 0x3b8   :  { %459 = vsyncpa [#allocation6 + $0x1], 1 }

</bundles_post_ra>
